<compile_context>
chip_gen: v5e
topology: v5e:2x2
jax: 0.10.0
libtpu: 0.0.40
codegen_flags: <defaults>
</compile_context>

<pallas_src>
import jax
import jax.numpy as jnp
from jax import lax
from jax.experimental import pallas as pl
from jax.experimental.pallas import tpu as pltpu


# ----------------------------------------------------------------------------
# Pallas kernel 1: fused FC head of expWeightV2
#   h = relu( bn3( x @ W1 + b1 ) );  out = h @ W2 + b2   (bn folded to scale/bias)
# ----------------------------------------------------------------------------
def _fc_head_kernel(x_ref, w1_ref, b1_ref, s_ref, t_ref, w2_ref, b2_ref, o_ref):
    h = jnp.dot(x_ref[...], w1_ref[...], preferred_element_type=jnp.float32)
    h = h + b1_ref[...]                      # fc1 bias
    h = h * s_ref[...] + t_ref[...]          # folded BatchNorm1d (eval mode)
    h = jnp.maximum(h, 0.0)                  # ReLU
    # fc2 (20 -> 1) on the MXU path instead of an XLU cross-lane sum.
    o_ref[...] = jnp.dot(h, w2_ref[...],
                         preferred_element_type=jnp.float32) + b2_ref[...]


def fc_head(x, w1, b1, bn_scale, bn_bias, w2_row, b2):
    b = x.shape[0]
    return pl.pallas_call(
        _fc_head_kernel,
        out_shape=jax.ShapeDtypeStruct((b, 1), jnp.float32),
        in_specs=[pl.BlockSpec(memory_space=pltpu.MemorySpace.VMEM)] * 7,
        out_specs=pl.BlockSpec(memory_space=pltpu.MemorySpace.VMEM),
    )(x, w1, b1.reshape(1, -1), bn_scale.reshape(1, -1),
      bn_bias.reshape(1, -1), w2_row.reshape(-1, 1), b2.reshape(1, 1))


# ----------------------------------------------------------------------------
# Pallas kernel 2: per-batch elementwise pow(x, w[b]) on the half-res image.
# One whole image per grid step; grid=(B,) stays "parallel" so v7x shards the
# batch across its two TensorCores.
# ----------------------------------------------------------------------------
def _pow_kernel(w_ref, x_ref, o_ref):
    w = w_ref[pl.program_id(0)]              # per-batch scalar exponent (SMEM, 1-D)
    # Guard log(0): clamp to a tiny positive value so x==0 pixels map to
    # exp(w*log(tiny)) ~= 0 for w>0 / 1 for w==0 (matching torch.pow behavior
    # on non-negative images up to underflow).
    x = jnp.maximum(x_ref[...], 1e-20)
    o_ref[...] = jnp.exp(w * jnp.log(x))


def pow_per_batch(x, w):
    """x: (B, 1, H, W) positive image;  w: (B,) per-batch exponents."""
    b, c, h, wd = x.shape
    assert c == 1
    assert h % 8 == 0 and wd % 128 == 0, (h, wd)
    return pl.pallas_call(
        _pow_kernel,
        out_shape=jax.ShapeDtypeStruct(x.shape, x.dtype),
        grid=(b,),
        in_specs=[
            pl.BlockSpec(memory_space=pltpu.MemorySpace.SMEM),            # w (B,)
            pl.BlockSpec((1, 1, h, wd), lambda i: (i, 0, 0, 0)),          # whole image
        ],
        out_specs=pl.BlockSpec((1, 1, h, wd), lambda i: (i, 0, 0, 0)),
        compiler_params=pltpu.CompilerParams(
            dimension_semantics=("parallel",)),
    )(w, x)


# ----------------------------------------------------------------------------
# expWeightV2 preamble (tiny maxpool / 1-channel 3x3 conv chain) in plain JAX
# ----------------------------------------------------------------------------
def _maxpool2d(x, k, s, pad_h=0, pad_w=0):
    return lax.reduce_window(
        x, -jnp.inf, lax.max,
        window_dimensions=(1, 1, k, k),
        window_strides=(1, 1, s, s),
        padding=((0, 0), (0, 0), (pad_h, pad_h), (pad_w, pad_w)))


def _conv3x3_s2(x, w, b):
    y = lax.conv_general_dilated(
        x, w, window_strides=(2, 2), padding=((1, 1), (1, 1)),
        dimension_numbers=('NCHW', 'OIHW', 'NCHW'))
    return y + b.reshape(1, -1, 1, 1)


def _bn2d_eval(x, gamma, beta, rm, rv, eps=1e-5):
    scale = gamma / jnp.sqrt(rv + eps)
    shift = beta - rm * scale
    return x * scale.reshape(1, -1, 1, 1) + shift.reshape(1, -1, 1, 1)


def exp_weight_v2(x, p):
    x = _maxpool2d(x, 4, 4)                                   # maxpool1
    x = _conv3x3_s2(x, p['conv1_w'], p['conv1_b'])            # conv1
    x = _bn2d_eval(x, p['bn1_g'], p['bn1_b'], p['bn1_rm'], p['bn1_rv'])
    x = jnp.maximum(x, 0.0)                                   # relu1
    x = _maxpool2d(x, 2, 2)                                   # maxpool2
    x = _conv3x3_s2(x, p['conv2_w'], p['conv2_b'])            # conv2
    x = _bn2d_eval(x, p['bn2_g'], p['bn2_b'], p['bn2_rm'], p['bn2_rv'])
    x = jnp.maximum(x, 0.0)                                   # relu2
    x = _maxpool2d(x, 2, 2, pad_h=1, pad_w=0)                 # maxpool3
    b = x.shape[0]
    x = x.reshape(b, -1)                                      # (b, 80)
    assert x.shape[1] == 80, x.shape
    # fc1 -> bn3 -> relu -> fc2 fused in the Pallas head kernel
    eps = 1e-5
    s = p['bn3_g'] / jnp.sqrt(p['bn3_rv'] + eps)
    t = p['bn3_b'] - p['bn3_rm'] * s
    return fc_head(x, p['fc1_w'], p['fc1_b'], s, t, p['fc2_w'], p['fc2_b'])


# ----------------------------------------------------------------------------
# createMask forward
# ----------------------------------------------------------------------------
def create_mask(x, params, enlightening):
    # F.interpolate(mode='nearest', scale_factor=1/r) with H, W divisible by r
    # selects exactly the elements at stride r starting at index 0, and those
    # grids all nest inside the stride-2 grid.  So compute pow only on the
    # half-res subsample and slice it for the coarser masks.
    w = exp_weight_v2(x, params) + enlightening               # (b, 1) exponent

    x_half = x[:, :, ::2, ::2]                                # stride-2 nearest grid
    powh = pow_per_batch(x_half, w.reshape(-1))               # pow(x, w) in Pallas

    mask2x = powh
    mask4x = powh[:, :, ::2, ::2]
    mask8x = powh[:, :, ::4, ::4]
    mask16x = powh[:, :, ::8, ::8]
    mask32x = powh[:, :, ::16, ::16]
    return (mask2x, mask4x, mask8x, mask16x, mask32x)


def init_params(key):
    ks = jax.random.split(key, 6)
    f32 = jnp.float32
    return {
        'conv1_w': 0.2 * jax.random.normal(ks[0], (1, 1, 3, 3), f32),
        'conv1_b': jnp.zeros((1,), f32),
        'bn1_g': jnp.ones((1,), f32), 'bn1_b': jnp.zeros((1,), f32),
        'bn1_rm': jnp.zeros((1,), f32), 'bn1_rv': jnp.ones((1,), f32),
        'conv2_w': 0.2 * jax.random.normal(ks[1], (1, 1, 3, 3), f32),
        'conv2_b': jnp.zeros((1,), f32),
        'bn2_g': jnp.ones((1,), f32), 'bn2_b': jnp.zeros((1,), f32),
        'bn2_rm': jnp.zeros((1,), f32), 'bn2_rv': jnp.ones((1,), f32),
        'fc1_w': 0.05 * jax.random.normal(ks[2], (80, 20), f32),   # (in, out)
        'fc1_b': 0.01 * jax.random.normal(ks[3], (20,), f32),
        'bn3_g': jnp.ones((20,), f32), 'bn3_b': jnp.zeros((20,), f32),
        'bn3_rm': jnp.zeros((20,), f32), 'bn3_rv': jnp.ones((20,), f32),
        'fc2_w': 0.05 * jax.random.normal(ks[4], (20,), f32),      # out_features=1
        'fc2_b': 0.01 * jax.random.normal(ks[5], (1,), f32),
    }


if __name__ == "__main__":
    key = jax.random.PRNGKey(0)
    k_param, k_x = jax.random.split(key)

    # fc1.in_features == 80 pins the input geometry: (H/64 + 1) * (W/64) == 80.
    # Smallest natural image-like choice: H=256, W=1024 (single channel).
    B, C, H, W = 2, 1, 256, 1024
    x = jax.random.uniform(k_x, (B, C, H, W), jnp.float32, minval=0.0, maxval=1.0)

    params = init_params(k_param)
    enlightening = 1.0

    masks = jax.jit(lambda xx: create_mask(xx, params, enlightening))(x)
    masks = jax.block_until_ready(masks)

    expected = [(B, C, H // r, W // r) for r in (2, 4, 8, 16, 32)]
    for m, es in zip(masks, expected):
        assert m.shape == es, (m.shape, es)
        assert bool(jnp.all(jnp.isfinite(m)))

    print("KERNEL_OK")
</pallas_src>

<mosaic_0001>
module attributes {stable_mosaic.version = 11 : i64} {
  func.func @_fc_head_kernel(%arg0: memref<2x80xf32, #tpu.memory_space<vmem>>, %arg1: memref<80x20xf32, #tpu.memory_space<vmem>>, %arg2: memref<1x20xf32, #tpu.memory_space<vmem>>, %arg3: memref<1x20xf32, #tpu.memory_space<vmem>>, %arg4: memref<1x20xf32, #tpu.memory_space<vmem>>, %arg5: memref<20x1xf32, #tpu.memory_space<vmem>>, %arg6: memref<1x1xf32, #tpu.memory_space<vmem>>, %arg7: memref<2x1xf32, #tpu.memory_space<vmem>>) attributes {dimension_semantics = [], scalar_prefetch = 0 : i64, scratch_operands = 0 : i64, tpu.core_type = #tpu.core_type<tc>} {
    %c0 = arith.constant 0 : index
    %c0_0 = arith.constant 0 : index
    %0 = vector.load %arg0[%c0, %c0_0] : memref<2x80xf32, #tpu.memory_space<vmem>>, vector<2x80xf32>
    %c0_1 = arith.constant 0 : index
    %c0_2 = arith.constant 0 : index
    %1 = vector.load %arg1[%c0_1, %c0_2] : memref<80x20xf32, #tpu.memory_space<vmem>>, vector<80x20xf32>
    %cst = arith.constant dense<0.000000e+00> : vector<2x20xf32>
    %2 = tpu.matmul %0, %1, %cst {dimension_numbers = #tpu.dot_dimension_numbers<[1], [0], [0], [1], [0, 0, 1, 1], [], []>} : vector<2x80xf32>, vector<80x20xf32>, vector<2x20xf32> -> vector<2x20xf32>
    %c0_3 = arith.constant 0 : index
    %c0_4 = arith.constant 0 : index
    %3 = vector.load %arg2[%c0_3, %c0_4] : memref<1x20xf32, #tpu.memory_space<vmem>>, vector<1x20xf32>
    %4 = vector.broadcast %3 : vector<1x20xf32> to vector<2x20xf32>
    %5 = arith.addf %2, %4 : vector<2x20xf32>
    %c0_5 = arith.constant 0 : index
    %c0_6 = arith.constant 0 : index
    %6 = vector.load %arg3[%c0_5, %c0_6] : memref<1x20xf32, #tpu.memory_space<vmem>>, vector<1x20xf32>
    %7 = vector.broadcast %6 : vector<1x20xf32> to vector<2x20xf32>
    %8 = arith.mulf %5, %7 : vector<2x20xf32>
    %c0_7 = arith.constant 0 : index
    %c0_8 = arith.constant 0 : index
    %9 = vector.load %arg4[%c0_7, %c0_8] : memref<1x20xf32, #tpu.memory_space<vmem>>, vector<1x20xf32>
    %10 = vector.broadcast %9 : vector<1x20xf32> to vector<2x20xf32>
    %11 = arith.addf %8, %10 : vector<2x20xf32>
    %cst_9 = arith.constant 0.000000e+00 : f32
    %12 = vector.broadcast %cst_9 : f32 to vector<2x20xf32>
    %13 = arith.maximumf %11, %12 : vector<2x20xf32>
    %c0_10 = arith.constant 0 : index
    %c0_11 = arith.constant 0 : index
    %14 = vector.load %arg5[%c0_10, %c0_11] : memref<20x1xf32, #tpu.memory_space<vmem>>, vector<20x1xf32>
    %cst_12 = arith.constant dense<0.000000e+00> : vector<2x1xf32>
    %15 = tpu.matmul %13, %14, %cst_12 {dimension_numbers = #tpu.dot_dimension_numbers<[1], [0], [0], [1], [0, 0, 1, 1], [], []>} : vector<2x20xf32>, vector<20x1xf32>, vector<2x1xf32> -> vector<2x1xf32>
    %c0_13 = arith.constant 0 : index
    %c0_14 = arith.constant 0 : index
    %16 = vector.load %arg6[%c0_13, %c0_14] : memref<1x1xf32, #tpu.memory_space<vmem>>, vector<1x1xf32>
    %17 = vector.broadcast %16 : vector<1x1xf32> to vector<2x1xf32>
    %18 = arith.addf %15, %17 : vector<2x1xf32>
    %c0_15 = arith.constant 0 : index
    %c0_16 = arith.constant 0 : index
    %19 = vector.load %arg7[%c0_15, %c0_16] : memref<2x1xf32, #tpu.memory_space<vmem>>, vector<2x1xf32>
    tpu.vector_store %arg7[%c0_15, %c0_16], %18 {strides = array<i32>} : memref<2x1xf32, #tpu.memory_space<vmem>>, vector<2x1xf32>,
    return
  }
}

module attributes {stable_mosaic.version = 11 : i64} {
  func.func @_pow_kernel(%arg0: i32, %arg1: memref<2xf32, #tpu.memory_space<smem>>, %arg2: memref<1x1x128x512xf32, #tpu.memory_space<vmem>>, %arg3: memref<1x1x128x512xf32, #tpu.memory_space<vmem>>) attributes {dimension_semantics = [#tpu.dimension_semantics<parallel>], iteration_bounds = array<i64: 2>, scalar_prefetch = 0 : i64, scratch_operands = 0 : i64, tpu.core_type = #tpu.core_type<tc>, window_params = [{transform_indices = @transform_0, window_bounds = array<i64: 2>}, {transform_indices = @transform_1, window_bounds = array<i64: 1, 1, 128, 512>}, {transform_indices = @transform_2, window_bounds = array<i64: 1, 1, 128, 512>}]} {
    %0 = arith.index_cast %arg0 : i32 to index
    %1 = memref.load %arg1[%0] : memref<2xf32, #tpu.memory_space<smem>>
    %c0 = arith.constant 0 : index
    %c0_0 = arith.constant 0 : index
    %c0_1 = arith.constant 0 : index
    %c0_2 = arith.constant 0 : index
    %2 = vector.load %arg2[%c0, %c0_0, %c0_1, %c0_2] : memref<1x1x128x512xf32, #tpu.memory_space<vmem>>, vector<1x1x128x512xf32>
    %cst = arith.constant 9.99999968E-21 : f32
    %3 = vector.broadcast %cst : f32 to vector<1x1x128x512xf32>
    %4 = arith.maximumf %2, %3 : vector<1x1x128x512xf32>
    %5 = math.log %4 : vector<1x1x128x512xf32>
    %6 = vector.broadcast %1 : f32 to vector<1x1x128x512xf32>
    %7 = arith.mulf %6, %5 : vector<1x1x128x512xf32>
    %8 = math.exp %7 : vector<1x1x128x512xf32>
    %c0_3 = arith.constant 0 : index
    %c0_4 = arith.constant 0 : index
    %c0_5 = arith.constant 0 : index
    %c0_6 = arith.constant 0 : index
    %9 = vector.load %arg3[%c0_3, %c0_4, %c0_5, %c0_6] : memref<1x1x128x512xf32, #tpu.memory_space<vmem>>, vector<1x1x128x512xf32>
    tpu.vector_store %arg3[%c0_3, %c0_4, %c0_5, %c0_6], %8 {strides = array<i32>} : memref<1x1x128x512xf32, #tpu.memory_space<vmem>>, vector<1x1x128x512xf32>,
    return
  }
  func.func @transform_0(%arg0: i32) -> i32 {
    %c0_i32 = arith.constant 0 : i32
    %c0_i32_0 = arith.constant 0 : i32
    return %c0_i32 : i32
  }
  func.func @transform_1(%arg0: i32) -> (i32, i32, i32, i32) {
    %c0_i32 = arith.constant 0 : i32
    %c0_i32_0 = arith.constant 0 : i32
    %c0_i32_1 = arith.constant 0 : i32
    %c0_i32_2 = arith.constant 0 : i32
    return %arg0, %c0_i32, %c0_i32_0, %c0_i32_1 : i32, i32, i32, i32
  }
  func.func @transform_2(%arg0: i32) -> (i32, i32, i32, i32) {
    %c0_i32 = arith.constant 0 : i32
    %c0_i32_0 = arith.constant 0 : i32
    %c0_i32_1 = arith.constant 0 : i32
    %c0_i32_2 = arith.constant 0 : i32
    return %arg0, %c0_i32, %c0_i32_0, %c0_i32_1 : i32, i32, i32, i32
  }
}

</mosaic_0001>

<bundles_post_ra>
// kernel: _lambda_.2
= control target key start
LH: loop header
LB: loop body
LE: loop exit
PB: predicated region body
PF: predicated region fallthrough
CT: control target
= control target key end

     0   :  { %vm43_vm0 = vcmask 654336   ;;  %vm89_vm1 = vcmask 1043456   ;;  %vm85_vm2 = vcmask 162816   ;;  %vm113_vm3 = vcmask 1024   ;;  %s223_s1 = inlined_call_operand.vmem [shape: f32[80,20], index: 1, kind: input, shape index: {}]   ;;  %s224_s2 = inlined_call_operand.vmem [shape: f32[1,20], index: 2, kind: input, shape index: {}]   ;;  %s225_s3 = inlined_call_operand.vmem [shape: f32[1,20], index: 3, kind: input, shape index: {}]   ;;  %s226_s0 = inlined_call_operand.vmem [shape: f32[2,80], index: 0, kind: input, shape index: {}]   ;;  %s227_s4 = inlined_call_operand.vmem [shape: f32[1,20], index: 4, kind: input, shape index: {}]   ;;  %s228_s5 = inlined_call_operand.vmem [shape: f32[20,1], index: 5, kind: input, shape index: {}]   ;;  %s229_s6 = inlined_call_operand.<no memory space> [shape: f32[1,1], index: 6, kind: input, shape index: {}]   ;;  %s230_s7 = inlined_call_operand.vmem [shape: f32[2,1], index: 7, kind: output, shape index: {}]  }
   0x1   :  { %v38_v0 = vld [vmem:[%s223_s1 + $0x48] sm:$0xff]  ;;  %v37_v1 = vld [vmem:[%s223_s1 + $0x40] sm:$0xff]  ;;  %v36_v2 = vld [vmem:[%s223_s1 + $0x38] sm:$0xff]  ;;  %v12_v14 = vstv %s229_s6 }
   0x2   :  { %53 = vmatpush.msra.mxu0 %v38_v0  ;;  %v35_v3 = vld [vmem:[%s223_s1 + $0x30] sm:$0xff]  ;;  %v34_v4 = vld [vmem:[%s223_s1 + $0x28] sm:$0xff]  ;;  %v33_v5 = vld [vmem:[%s223_s1 + $0x20] sm:$0xff]  ;;  %13 = vst [vmem:[#allocation2] sm:$0x1] %v12_v14 }
   0x3   :  { %v32_v6 = vld [vmem:[%s223_s1 + $0x18] sm:$0xff]  ;;  %v31_v7 = vld [vmem:[%s223_s1 + $0x10] sm:$0xff]  ;;  %v30_v8 = vld [vmem:[%s223_s1 + $0x8] sm:$0xff] }
   0x4   :  { %54 = vmatpush.msra.mxu0 %v37_v1  ;;  %v29_v9 = vld [vmem:[%s223_s1] sm:$0xff]  ;;  %v80_v11 = vld [vmem:[%s228_s5 + $0x10] sm:$0xf]  ;;  %v79_v12 = vld [vmem:[%s228_s5 + $0x8] sm:$0xff] }
   0x5   :  { %v28_v10 = vld [vmem:[%s226_s0] sm:$0x3]  ;;  %120 = vmatpush.msk.msra.mxu1 %vm89_vm1, %v80_v11 }
   0x6   :  { %55 = vmatpush.msra.mxu0 %v36_v2  ;;  %v78_v13 = vld [vmem:[%s228_s5] sm:$0xff] }
   0x7   :  { %107 = vmatpush.msra.mxu1 %v79_v12  ;;  %v122_v15 = vld [vmem:[%s224_s2] ss:$0 sm:$0xff] }
   0x8   :  { %56 = vmatpush.msra.mxu0 %v35_v3  ;;  %v123_v16 = vld [vmem:[%s225_s3] ss:$0 sm:$0xff] }
   0x9   :  { %108 = vmatpush.msra.mxu1 %v78_v13  ;;  %v124_v19 = vld [vmem:[%s227_s4] ss:$0 sm:$0xff] }
   0xa   :  { %57 = vmatpush.msra.mxu0 %v34_v4  ;;  %v125_v23 = vld [vmem:[#allocation2] ss:$0 sm:$0xff] }
   0xc   :  { %58 = vmatpush.msra.mxu0 %v33_v5 }
   0xe   :  { %59 = vmatpush.msra.mxu0 %v32_v6 }
  0x10   :  { %60 = vmatpush.msra.mxu0 %v31_v7 }
  0x12   :  { %61 = vmatpush.msra.mxu0 %v30_v8 }
  0x14   :  { %62 = vmatpush.msra.mxu0 %v29_v9 }
  0x15   :  { %119 = vmatmul.msk.f32.vlgmr.msra.gmra.mxu0 %vm43_vm0, %v28_v10 }
  0x92   :  { %v64_v17 = vpop.f32.mrf.mxu0 }
  0x93   :  { %v65_v18 = vadd.f32 %v122_v15, %v64_v17 }
  0x95   :  { %v71_v20 = vmul.f32 %v123_v16, %v65_v18 }
  0x97   :  { %v76_v21 = vadd.f32 %v124_v19, %v71_v20 }
  0x99   :  { %v77_v22 = vmax.f32 %v76_v21, 0.0 }
  0x9b   :  { %121 = vmatmul.msk.f32.vlgmr.msra.gmra.mxu1 %vm85_vm2, %v77_v22 }
 0x118   :  { %v110_v24 = vpop.f32.mrf.mxu1 }
 0x119   :  { %v111_v25 = vadd.f32 %v125_v23, %v110_v24 }
 0x11b   :  { %114 = vst.msk [vmem:[%s230_s7] sm:$0x3] %vm113_vm3, %v111_v25 }

// kernel: _lambda_.3
= control target key start
LH: loop header
LB: loop body
LE: loop exit
PB: predicated region body
PF: predicated region fallthrough
CT: control target
= control target key end

     0   :  { %7 = vsyncpa [#allocation3], 0  ;;  %s1072_s9 = smov 0   ;;  %s1300_s0 = inlined_call_operand.vmem [shape: f32[2], index: 0, kind: input, shape index: {}]   ;;  %s1301_s1 = inlined_call_operand.vmem [shape: f32[2,1,128,512], index: 1, kind: input, shape index: {}]   ;;  %s1302_s2 = inlined_call_operand.vmem [shape: f32[2,1,128,512], index: 2, kind: output, shape index: {}]  }
   0x1 LB: > { %s739_s10 = sadd.s32 4294967295, %s1054_s9   ;;  %p741_p0 = scmp.ge.s32.totalorder %s1054_s9, 1  ;;  %s1054_s9 = sphi %s1072_s9, %s13_s9  }
   0x2   : > { %p91_p1 = scmp.lt.s32.totalorder %s1054_s9, 3  ;;  %s103_s13 = sshll.u32 %s1300_s0, 4  ;;  %s104_s13 = int_to_ptr.vmem [resolvable:$true] %s103_s13 }
   0x3   : > { %p762_p3 = scmp.eq.s32.totalorder %s739_s10, 0  ;;  %s1056_s14 = smov [#allocation2]  }
   0x4   : > { %p92_p2 = pnand %p741_p0, %p91_p1 }
   0x6   : > { %p758_p4 = pneg %p92_p2  ;;  %124 = sbr.rel (%p92_p2) target bundleno = 159 (0x9f), region = 28 }
   0x8   : > { %p759_p5 = pnand %p762_p3, %p758_p4 }
   0xa   : > { %761 = dma.vmem_to_smem (!%p759_p5), %s104_s13, 16, %s1056_s14, [#allocation3]  }
   0xb   : > { %1049 = dma.done.wait (%p762_p3), [#allocation3], 16  }
   0xc   : > { %1051 = vsyncadd (%p762_p3), [#allocation3], 4294967280 }
   0xd   : > { %131 = sfence }
   0xe   : > { %p148_p6 = scmp.lt.s32.totalorder %s739_s10, 1  ;;  %s1093_s20 = sld [smem:[#allocation2 + %s739_s10]] }
  0x10   : > { %s1083_s15 = scalar_select %p148_p6, %s739_s10, 1 }
  0x12   : > { %s752_s16 = sshll.u32 %s1083_s15, 9 }
  0x13   : > { %s1091_s19 = scalar_lea.vmem %s1301_s1, %s752_s16  ;;  %s1124_s23 = scalar_lea.vmem %s1302_s2, %s752_s16 }
  0x14   : > { %v159_v0 = vld [vmem:[%s1091_s19] sm:$0xff]  ;;  %v160_v1 = vld [vmem:[%s1091_s19 + $0x8] sm:$0xff]  ;;  %v161_v2 = vld [vmem:[%s1091_s19 + $0x10] sm:$0xff]  ;;  %v1109_v24 = vstv %s1093_s20 }
  0x15   : > { %v223_v3 = vmax.f32 %v159_v0, 1e-20  ;;  %v224_v4 = vmax.f32 %v160_v1, 1e-20  ;;  %v225_v5 = vmax.f32 %v161_v2, 1e-20 }
  0x16   : > { %v162_v6 = vld [vmem:[%s1091_s19 + $0x18] sm:$0xff]  ;;  %v163_v7 = vld [vmem:[%s1091_s19 + $0x20] sm:$0xff]  ;;  %v164_v8 = vld [vmem:[%s1091_s19 + $0x28] sm:$0xff] }
  0x17   : > { %773 = vlog2.f32 %v223_v3  ;;  %v226_v9 = vmax.f32 %v162_v6, 1e-20  ;;  %v227_v10 = vmax.f32 %v163_v7, 1e-20  ;;  %v228_v11 = vmax.f32 %v164_v8, 1e-20 }
  0x18   : > { %775 = vlog2.f32 %v224_v4  ;;  %v165_v12 = vld [vmem:[%s1091_s19 + $0x30] sm:$0xff]  ;;  %v166_v13 = vld [vmem:[%s1091_s19 + $0x38] sm:$0xff]  ;;  %v167_v14 = vld [vmem:[%s1091_s19 + $0x40] sm:$0xff] }
  0x19   : > { %777 = vlog2.f32 %v225_v5  ;;  %v229_v15 = vmax.f32 %v165_v12, 1e-20  ;;  %v230_v16 = vmax.f32 %v166_v13, 1e-20  ;;  %v168_v17 = vld [vmem:[%s1091_s19 + $0x48] sm:$0xff]  ;;  %v169_v18 = vld [vmem:[%s1091_s19 + $0x50] sm:$0xff] }
  0x1a   : > { %779 = vlog2.f32 %v226_v9  ;;  %v231_v19 = vmax.f32 %v167_v14, 1e-20  ;;  %v170_v20 = vld [vmem:[%s1091_s19 + $0x58] sm:$0xff]  ;;  %v232_v21 = vmax.f32 %v168_v17, 1e-20  ;;  %v171_v22 = vld [vmem:[%s1091_s19 + $0x60] sm:$0xff] }
  0x1b   : > { %781 = vlog2.f32 %v227_v10  ;;  %v233_v25 = vmax.f32 %v169_v18, 1e-20  ;;  %v234_v28 = vmax.f32 %v170_v20, 1e-20  ;;  %v235_v31 = vmax.f32 %v171_v22, 1e-20 }
  0x1c   : > { %783 = vlog2.f32 %v228_v11  ;;  %v172_v10 = vld [vmem:[%s1091_s19 + $0x68] sm:$0xff]  ;;  %v173_v14 = vld [vmem:[%s1091_s19 + $0x70] sm:$0xff]  ;;  %v174_v18 = vld [vmem:[%s1091_s19 + $0x78] sm:$0xff] }
  0x1d   : > { %v774_v23 = vpop.eup %773  ;;  %785 = vlog2.f32 %v229_v15  ;;  %v175_v22 = vld [vmem:[%s1091_s19 + $0x80] sm:$0xff] }
  0x1e   : > { %v776_v26 = vpop.eup %775  ;;  %v288_v27 = vmul.f32 0.6931472, %v774_v23  ;;  %787 = vlog2.f32 %v230_v16 }
  0x1f   : > { %v778_v29 = vpop.eup %777  ;;  %v290_v30 = vmul.f32 0.6931472, %v776_v26  ;;  %789 = vlog2.f32 %v231_v19  ;;  %v237_v26 = vmax.f32 %v173_v14, 1e-20 }
  0x20   : > { %v780_v32 = vpop.eup %779  ;;  %v416_v33 = vmul.f32 %v1109_v24, %v288_v27  ;;  %v292_v34 = vmul.f32 0.6931472, %v778_v29  ;;  %791 = vlog2.f32 %v232_v21  ;;  %v236_v21 = vmax.f32 %v172_v10, 1e-20  ;;  %v176_v27 = vld [vmem:[%s1091_s19 + $0x88] sm:$0xff] }
  0x21   : > { %v782_v35 = vpop.eup %781  ;;  %v417_v36 = vmul.f32 %v1109_v24, %v290_v30  ;;  %v294_v37 = vmul.f32 0.6931472, %v780_v32  ;;  %793 = vlog2.f32 %v233_v25  ;;  %v238_v29 = vmax.f32 %v174_v18, 1e-20  ;;  %v177_v30 = vld [vmem:[%s1091_s19 + $0x90] sm:$0xff] }
  0x22   : > { %v784_v38 = vpop.eup %783  ;;  %v480_v39 = vmul.f32 1.442695, %v416_v33  ;;  %v418_v40 = vmul.f32 %v1109_v24, %v292_v34  ;;  %v296_v41 = vmul.f32 0.6931472, %v782_v35  ;;  %795 = vlog2.f32 %v234_v28  ;;  %v178_v33 = vld [vmem:[%s1091_s19 + $0x98] sm:$0xff] }
  0x23   : > { %v786_v42 = vpop.eup %785  ;;  %v482_v43 = vmul.f32 1.442695, %v417_v36  ;;  %v419_v44 = vmul.f32 %v1109_v24, %v294_v37  ;;  %v298_v45 = vmul.f32 0.6931472, %v784_v38  ;;  %797 = vlog2.f32 %v235_v31  ;;  %v179_v36 = vld [vmem:[%s1091_s19 + $0xa0] sm:$0xff] }
  0x24   : > { %v788_v46 = vpop.eup %787  ;;  %799 = vpow2.f32 %v480_v39  ;;  %v484_v47 = vmul.f32 1.442695, %v418_v40  ;;  %v420_v48 = vmul.f32 %v1109_v24, %v296_v41  ;;  %v300_v49 = vmul.f32 0.6931472, %v786_v42  ;;  %v180_v39 = vld [vmem:[%s1091_s19 + $0xa8] sm:$0xff]  ;;  %v181_v42 = vld [vmem:[%s1091_s19 + $0xb0] sm:$0xff] }
  0x25   : > { %v790_v50 = vpop.eup %789  ;;  %801 = vpow2.f32 %v482_v43  ;;  %v486_v51 = vmul.f32 1.442695, %v419_v44  ;;  %v421_v52 = vmul.f32 %v1109_v24, %v298_v45  ;;  %v302_v53 = vmul.f32 0.6931472, %v788_v46  ;;  %v182_v45 = vld [vmem:[%s1091_s19 + $0xb8] sm:$0xff] }
  0x26   : > { %v792_v54 = vpop.eup %791  ;;  %803 = vpow2.f32 %v484_v47  ;;  %v488_v55 = vmul.f32 1.442695, %v420_v48  ;;  %v422_v56 = vmul.f32 %v1109_v24, %v300_v49  ;;  %v304_v57 = vmul.f32 0.6931472, %v790_v50  ;;  %v183_v48 = vld [vmem:[%s1091_s19 + $0xc0] sm:$0xff] }
  0x27   : > { %v794_v58 = vpop.eup %793  ;;  %805 = vpow2.f32 %v486_v51  ;;  %v490_v59 = vmul.f32 1.442695, %v421_v52  ;;  %v423_v60 = vmul.f32 %v1109_v24, %v302_v53  ;;  %v306_v61 = vmul.f32 0.6931472, %v792_v54  ;;  %v184_v51 = vld [vmem:[%s1091_s19 + $0xc8] sm:$0xff] }
  0x28   : > { %v796_v62 = vpop.eup %795  ;;  %807 = vpow2.f32 %v488_v55  ;;  %v492_v63 = vmul.f32 1.442695, %v422_v56  ;;  %v424_v0 = vmul.f32 %v1109_v24, %v304_v57  ;;  %v308_v1 = vmul.f32 0.6931472, %v794_v58 }
  0x29   : > { %v798_v2 = vpop.eup %797  ;;  %809 = vpow2.f32 %v490_v59  ;;  %v494_v3 = vmul.f32 1.442695, %v423_v60  ;;  %v425_v4 = vmul.f32 %v1109_v24, %v306_v61  ;;  %v310_v5 = vmul.f32 0.6931472, %v796_v62 }
  0x2a   : > { %v800_v6 = vpop.eup %799  ;;  %811 = vpow2.f32 %v492_v63  ;;  %v496_v7 = vmul.f32 1.442695, %v424_v0  ;;  %v426_v8 = vmul.f32 %v1109_v24, %v308_v1  ;;  %v312_v9 = vmul.f32 0.6931472, %v798_v2 }
  0x2b   : > { %v802_v11 = vpop.eup %801  ;;  %608 = vst [vmem:[%s1124_s23] sm:$0xff] %v800_v6  ;;  %813 = vpow2.f32 %v494_v3  ;;  %v498_v12 = vmul.f32 1.442695, %v425_v4  ;;  %v427_v13 = vmul.f32 %v1109_v24, %v310_v5  ;;  %v239_v32 = vmax.f32 %v175_v22, 1e-20 }
  0x2c   : > { %v804_v15 = vpop.eup %803  ;;  %609 = vst [vmem:[%s1124_s23 + $0x8] sm:$0xff] %v802_v11  ;;  %815 = vpow2.f32 %v496_v7  ;;  %v500_v16 = vmul.f32 1.442695, %v426_v8  ;;  %v428_v17 = vmul.f32 %v1109_v24, %v312_v9  ;;  %v240_v35 = vmax.f32 %v176_v27, 1e-20 }
  0x2d   : > { %v806_v19 = vpop.eup %805  ;;  %610 = vst [vmem:[%s1124_s23 + $0x10] sm:$0xff] %v804_v15  ;;  %817 = vpow2.f32 %v498_v12  ;;  %v502_v20 = vmul.f32 1.442695, %v427_v13  ;;  %v241_v38 = vmax.f32 %v177_v30, 1e-20 }
  0x2e   : > { %v808_v23 = vpop.eup %807  ;;  %611 = vst [vmem:[%s1124_s23 + $0x18] sm:$0xff] %v806_v19  ;;  %819 = vpow2.f32 %v500_v16  ;;  %v504_v25 = vmul.f32 1.442695, %v428_v17  ;;  %v242_v41 = vmax.f32 %v178_v33, 1e-20 }
  0x2f   : > { %v810_v28 = vpop.eup %809  ;;  %612 = vst [vmem:[%s1124_s23 + $0x20] sm:$0xff] %v808_v23  ;;  %821 = vpow2.f32 %v502_v20  ;;  %v243_v44 = vmax.f32 %v179_v36, 1e-20  ;;  %v244_v47 = vmax.f32 %v180_v39, 1e-20  ;;  %v185_v39 = vld [vmem:[%s1091_s19 + $0xd0] sm:$0xff] }
  0x30   : > { %v812_v31 = vpop.eup %811  ;;  %613 = vst [vmem:[%s1124_s23 + $0x28] sm:$0xff] %v810_v28  ;;  %823 = vpow2.f32 %v504_v25  ;;  %v245_v50 = vmax.f32 %v181_v42, 1e-20  ;;  %v246_v53 = vmax.f32 %v182_v45, 1e-20 }
  0x31   : > { %v814_v34 = vpop.eup %813  ;;  %614 = vst [vmem:[%s1124_s23 + $0x30] sm:$0xff] %v812_v31  ;;  %825 = vlog2.f32 %v236_v21  ;;  %v247_v56 = vmax.f32 %v183_v48, 1e-20  ;;  %v248_v59 = vmax.f32 %v184_v51, 1e-20  ;;  %v188_v51 = vld [vmem:[%s1091_s19 + $0xe8] sm:$0xff] }
  0x32   : > { %v816_v37 = vpop.eup %815  ;;  %615 = vst [vmem:[%s1124_s23 + $0x38] sm:$0xff] %v814_v34  ;;  %827 = vlog2.f32 %v237_v26 }
  0x33   : > { %v818_v40 = vpop.eup %817  ;;  %616 = vst [vmem:[%s1124_s23 + $0x40] sm:$0xff] %v816_v37  ;;  %829 = vlog2.f32 %v238_v29 }
  0x34   : > { %v820_v43 = vpop.eup %819  ;;  %617 = vst [vmem:[%s1124_s23 + $0x48] sm:$0xff] %v818_v40  ;;  %831 = vlog2.f32 %v239_v32 }
  0x35   : > { %v822_v46 = vpop.eup %821  ;;  %618 = vst [vmem:[%s1124_s23 + $0x50] sm:$0xff] %v820_v43  ;;  %833 = vlog2.f32 %v240_v35  ;;  %v186_v43 = vld [vmem:[%s1091_s19 + $0xd8] sm:$0xff] }
  0x36   : > { %v824_v49 = vpop.eup %823  ;;  %619 = vst [vmem:[%s1124_s23 + $0x58] sm:$0xff] %v822_v46  ;;  %835 = vlog2.f32 %v241_v38 }
  0x37   : > { %v826_v52 = vpop.eup %825  ;;  %620 = vst [vmem:[%s1124_s23 + $0x60] sm:$0xff] %v824_v49  ;;  %837 = vlog2.f32 %v242_v41 }
  0x38   : > { %v828_v54 = vpop.eup %827  ;;  %v314_v55 = vmul.f32 0.6931472, %v826_v52  ;;  %839 = vlog2.f32 %v243_v44 }
  0x39   : > { %v830_v57 = vpop.eup %829  ;;  %v316_v58 = vmul.f32 0.6931472, %v828_v54  ;;  %841 = vlog2.f32 %v244_v47  ;;  %v187_v47 = vld [vmem:[%s1091_s19 + $0xe0] sm:$0xff]  ;;  %v250_v54 = vmax.f32 %v186_v43, 1e-20 }
  0x3a   : > { %v832_v60 = vpop.eup %831  ;;  %v429_v61 = vmul.f32 %v1109_v24, %v314_v55  ;;  %v318_v62 = vmul.f32 0.6931472, %v830_v57  ;;  %843 = vlog2.f32 %v245_v50  ;;  %v249_v50 = vmax.f32 %v185_v39, 1e-20  ;;  %v189_v55 = vld [vmem:[%s1091_s19 + $0xf0] sm:$0xff] }
  0x3b   : > { %v834_v63 = vpop.eup %833  ;;  %v430_v0 = vmul.f32 %v1109_v24, %v316_v58  ;;  %v320_v1 = vmul.f32 0.6931472, %v832_v60  ;;  %845 = vlog2.f32 %v246_v53  ;;  %v251_v57 = vmax.f32 %v187_v47, 1e-20  ;;  %v190_v58 = vld [vmem:[%s1091_s19 + $0xf8] sm:$0xff] }
  0x3c   : > { %v836_v2 = vpop.eup %835  ;;  %v506_v3 = vmul.f32 1.442695, %v429_v61  ;;  %v431_v4 = vmul.f32 %v1109_v24, %v318_v62  ;;  %v322_v5 = vmul.f32 0.6931472, %v834_v63  ;;  %847 = vlog2.f32 %v247_v56  ;;  %v191_v61 = vld [vmem:[%s1091_s19 + $0x100] sm:$0xff] }
  0x3d   : > { %v838_v6 = vpop.eup %837  ;;  %v508_v7 = vmul.f32 1.442695, %v430_v0  ;;  %v432_v8 = vmul.f32 %v1109_v24, %v320_v1  ;;  %v324_v9 = vmul.f32 0.6931472, %v836_v2  ;;  %849 = vlog2.f32 %v248_v59  ;;  %v192_v0 = vld [vmem:[%s1091_s19 + $0x108] sm:$0xff] }
  0x3e   : > { %v840_v10 = vpop.eup %839  ;;  %851 = vpow2.f32 %v506_v3  ;;  %v510_v11 = vmul.f32 1.442695, %v431_v4  ;;  %v433_v12 = vmul.f32 %v1109_v24, %v322_v5  ;;  %v326_v13 = vmul.f32 0.6931472, %v838_v6  ;;  %v193_v3 = vld [vmem:[%s1091_s19 + $0x110] sm:$0xff]  ;;  %v194_v6 = vld [vmem:[%s1091_s19 + $0x118] sm:$0xff] }
  0x3f   : > { %v842_v14 = vpop.eup %841  ;;  %853 = vpow2.f32 %v508_v7  ;;  %v512_v15 = vmul.f32 1.442695, %v432_v8  ;;  %v434_v16 = vmul.f32 %v1109_v24, %v324_v9  ;;  %v328_v17 = vmul.f32 0.6931472, %v840_v10  ;;  %v195_v9 = vld [vmem:[%s1091_s19 + $0x120] sm:$0xff] }
  0x40   : > { %v844_v18 = vpop.eup %843  ;;  %855 = vpow2.f32 %v510_v11  ;;  %v514_v19 = vmul.f32 1.442695, %v433_v12  ;;  %v435_v20 = vmul.f32 %v1109_v24, %v326_v13  ;;  %v330_v21 = vmul.f32 0.6931472, %v842_v14  ;;  %v196_v12 = vld [vmem:[%s1091_s19 + $0x128] sm:$0xff] }
  0x41   : > { %v846_v22 = vpop.eup %845  ;;  %857 = vpow2.f32 %v512_v15  ;;  %v516_v23 = vmul.f32 1.442695, %v434_v16  ;;  %v436_v25 = vmul.f32 %v1109_v24, %v328_v17  ;;  %v332_v26 = vmul.f32 0.6931472, %v844_v18  ;;  %v197_v15 = vld [vmem:[%s1091_s19 + $0x130] sm:$0xff] }
  0x42   : > { %v848_v27 = vpop.eup %847  ;;  %859 = vpow2.f32 %v514_v19  ;;  %v518_v28 = vmul.f32 1.442695, %v435_v20  ;;  %v437_v29 = vmul.f32 %v1109_v24, %v330_v21  ;;  %v334_v30 = vmul.f32 0.6931472, %v846_v22 }
  0x43   : > { %v850_v31 = vpop.eup %849  ;;  %861 = vpow2.f32 %v516_v23  ;;  %v520_v32 = vmul.f32 1.442695, %v436_v25  ;;  %v438_v33 = vmul.f32 %v1109_v24, %v332_v26  ;;  %v336_v34 = vmul.f32 0.6931472, %v848_v27 }
  0x44   : > { %v852_v35 = vpop.eup %851  ;;  %863 = vpow2.f32 %v518_v28  ;;  %v522_v36 = vmul.f32 1.442695, %v437_v29  ;;  %v439_v37 = vmul.f32 %v1109_v24, %v334_v30  ;;  %v338_v38 = vmul.f32 0.6931472, %v850_v31 }
  0x45   : > { %v854_v40 = vpop.eup %853  ;;  %621 = vst [vmem:[%s1124_s23 + $0x68] sm:$0xff] %v852_v35  ;;  %865 = vpow2.f32 %v520_v32  ;;  %v524_v41 = vmul.f32 1.442695, %v438_v33  ;;  %v440_v42 = vmul.f32 %v1109_v24, %v336_v34  ;;  %v252_v60 = vmax.f32 %v188_v51, 1e-20 }
  0x46   : > { %v856_v44 = vpop.eup %855  ;;  %622 = vst [vmem:[%s1124_s23 + $0x70] sm:$0xff] %v854_v40  ;;  %867 = vpow2.f32 %v522_v36  ;;  %v526_v45 = vmul.f32 1.442695, %v439_v37  ;;  %v441_v46 = vmul.f32 %v1109_v24, %v338_v38  ;;  %v253_v63 = vmax.f32 %v189_v55, 1e-20 }
  0x47   : > { %v858_v48 = vpop.eup %857  ;;  %623 = vst [vmem:[%s1124_s23 + $0x78] sm:$0xff] %v856_v44  ;;  %869 = vpow2.f32 %v524_v41  ;;  %v528_v49 = vmul.f32 1.442695, %v440_v42  ;;  %v254_v2 = vmax.f32 %v190_v58, 1e-20 }
  0x48   : > { %v860_v52 = vpop.eup %859  ;;  %624 = vst [vmem:[%s1124_s23 + $0x80] sm:$0xff] %v858_v48  ;;  %871 = vpow2.f32 %v526_v45  ;;  %v530_v53 = vmul.f32 1.442695, %v441_v46  ;;  %v255_v5 = vmax.f32 %v191_v61, 1e-20 }
  0x49   : > { %v862_v56 = vpop.eup %861  ;;  %625 = vst [vmem:[%s1124_s23 + $0x88] sm:$0xff] %v860_v52  ;;  %873 = vpow2.f32 %v528_v49  ;;  %v256_v8 = vmax.f32 %v192_v0, 1e-20  ;;  %v257_v11 = vmax.f32 %v193_v3, 1e-20  ;;  %v198_v3 = vld [vmem:[%s1091_s19 + $0x138] sm:$0xff] }
  0x4a   : > { %v864_v59 = vpop.eup %863  ;;  %626 = vst [vmem:[%s1124_s23 + $0x90] sm:$0xff] %v862_v56  ;;  %875 = vpow2.f32 %v530_v53  ;;  %v258_v14 = vmax.f32 %v194_v6, 1e-20  ;;  %v259_v17 = vmax.f32 %v195_v9, 1e-20 }
  0x4b   : > { %v866_v62 = vpop.eup %865  ;;  %627 = vst [vmem:[%s1124_s23 + $0x98] sm:$0xff] %v864_v59  ;;  %877 = vlog2.f32 %v249_v50  ;;  %v260_v20 = vmax.f32 %v196_v12, 1e-20  ;;  %v261_v23 = vmax.f32 %v197_v15, 1e-20  ;;  %v201_v15 = vld [vmem:[%s1091_s19 + $0x150] sm:$0xff] }
  0x4c   : > { %v868_v1 = vpop.eup %867  ;;  %628 = vst [vmem:[%s1124_s23 + $0xa0] sm:$0xff] %v866_v62  ;;  %879 = vlog2.f32 %v250_v54 }
  0x4d   : > { %v870_v4 = vpop.eup %869  ;;  %629 = vst [vmem:[%s1124_s23 + $0xa8] sm:$0xff] %v868_v1  ;;  %881 = vlog2.f32 %v251_v57 }
  0x4e   : > { %v872_v7 = vpop.eup %871  ;;  %630 = vst [vmem:[%s1124_s23 + $0xb0] sm:$0xff] %v870_v4  ;;  %883 = vlog2.f32 %v252_v60 }
  0x4f   : > { %v874_v10 = vpop.eup %873  ;;  %631 = vst [vmem:[%s1124_s23 + $0xb8] sm:$0xff] %v872_v7  ;;  %885 = vlog2.f32 %v253_v63  ;;  %v199_v7 = vld [vmem:[%s1091_s19 + $0x140] sm:$0xff] }
  0x50   : > { %v876_v13 = vpop.eup %875  ;;  %632 = vst [vmem:[%s1124_s23 + $0xc0] sm:$0xff] %v874_v10  ;;  %887 = vlog2.f32 %v254_v2 }
  0x51   : > { %v878_v16 = vpop.eup %877  ;;  %633 = vst [vmem:[%s1124_s23 + $0xc8] sm:$0xff] %v876_v13  ;;  %889 = vlog2.f32 %v255_v5 }
  0x52   : > { %v880_v18 = vpop.eup %879  ;;  %v340_v19 = vmul.f32 0.6931472, %v878_v16  ;;  %891 = vlog2.f32 %v256_v8 }
  0x53   : > { %v882_v21 = vpop.eup %881  ;;  %v342_v22 = vmul.f32 0.6931472, %v880_v18  ;;  %893 = vlog2.f32 %v257_v11  ;;  %v200_v11 = vld [vmem:[%s1091_s19 + $0x148] sm:$0xff]  ;;  %v263_v18 = vmax.f32 %v199_v7, 1e-20 }
  0x54   : > { %v884_v25 = vpop.eup %883  ;;  %v442_v26 = vmul.f32 %v1109_v24, %v340_v19  ;;  %v344_v27 = vmul.f32 0.6931472, %v882_v21  ;;  %895 = vlog2.f32 %v258_v14  ;;  %v262_v14 = vmax.f32 %v198_v3, 1e-20  ;;  %v202_v19 = vld [vmem:[%s1091_s19 + $0x158] sm:$0xff] }
  0x55   : > { %v886_v28 = vpop.eup %885  ;;  %v443_v29 = vmul.f32 %v1109_v24, %v342_v22  ;;  %v346_v30 = vmul.f32 0.6931472, %v884_v25  ;;  %897 = vlog2.f32 %v259_v17  ;;  %v264_v21 = vmax.f32 %v200_v11, 1e-20  ;;  %v203_v22 = vld [vmem:[%s1091_s19 + $0x160] sm:$0xff] }
  0x56   : > { %v888_v31 = vpop.eup %887  ;;  %v532_v32 = vmul.f32 1.442695, %v442_v26  ;;  %v444_v33 = vmul.f32 %v1109_v24, %v344_v27  ;;  %v348_v34 = vmul.f32 0.6931472, %v886_v28  ;;  %899 = vlog2.f32 %v260_v20  ;;  %v204_v26 = vld [vmem:[%s1091_s19 + $0x168] sm:$0xff] }
  0x57   : > { %v890_v35 = vpop.eup %889  ;;  %v534_v36 = vmul.f32 1.442695, %v443_v29  ;;  %v445_v37 = vmul.f32 %v1109_v24, %v346_v30  ;;  %v350_v38 = vmul.f32 0.6931472, %v888_v31  ;;  %901 = vlog2.f32 %v261_v23  ;;  %v205_v29 = vld [vmem:[%s1091_s19 + $0x170] sm:$0xff] }
  0x58   : > { %v892_v39 = vpop.eup %891  ;;  %903 = vpow2.f32 %v532_v32  ;;  %v536_v40 = vmul.f32 1.442695, %v444_v33  ;;  %v446_v41 = vmul.f32 %v1109_v24, %v348_v34  ;;  %v352_v42 = vmul.f32 0.6931472, %v890_v35  ;;  %v206_v32 = vld [vmem:[%s1091_s19 + $0x178] sm:$0xff]  ;;  %v207_v35 = vld [vmem:[%s1091_s19 + $0x180] sm:$0xff] }
  0x59   : > { %v894_v43 = vpop.eup %893  ;;  %905 = vpow2.f32 %v534_v36  ;;  %v538_v44 = vmul.f32 1.442695, %v445_v37  ;;  %v447_v45 = vmul.f32 %v1109_v24, %v350_v38  ;;  %v354_v46 = vmul.f32 0.6931472, %v892_v39  ;;  %v208_v38 = vld [vmem:[%s1091_s19 + $0x188] sm:$0xff] }
  0x5a   : > { %v896_v47 = vpop.eup %895  ;;  %907 = vpow2.f32 %v536_v40  ;;  %v540_v48 = vmul.f32 1.442695, %v446_v41  ;;  %v448_v49 = vmul.f32 %v1109_v24, %v352_v42  ;;  %v356_v50 = vmul.f32 0.6931472, %v894_v43  ;;  %v209_v41 = vld [vmem:[%s1091_s19 + $0x190] sm:$0xff] }
  0x5b   : > { %v898_v51 = vpop.eup %897  ;;  %909 = vpow2.f32 %v538_v44  ;;  %v542_v52 = vmul.f32 1.442695, %v447_v45  ;;  %v449_v53 = vmul.f32 %v1109_v24, %v354_v46  ;;  %v358_v54 = vmul.f32 0.6931472, %v896_v47  ;;  %v210_v44 = vld [vmem:[%s1091_s19 + $0x198] sm:$0xff] }
  0x5c   : > { %v900_v55 = vpop.eup %899  ;;  %911 = vpow2.f32 %v540_v48  ;;  %v544_v56 = vmul.f32 1.442695, %v448_v49  ;;  %v450_v57 = vmul.f32 %v1109_v24, %v356_v50  ;;  %v360_v58 = vmul.f32 0.6931472, %v898_v51 }
  0x5d   : > { %v902_v59 = vpop.eup %901  ;;  %913 = vpow2.f32 %v542_v52  ;;  %v546_v60 = vmul.f32 1.442695, %v449_v53  ;;  %v451_v61 = vmul.f32 %v1109_v24, %v358_v54  ;;  %v362_v62 = vmul.f32 0.6931472, %v900_v55 }
  0x5e   : > { %v904_v63 = vpop.eup %903  ;;  %915 = vpow2.f32 %v544_v56  ;;  %v548_v0 = vmul.f32 1.442695, %v450_v57  ;;  %v452_v1 = vmul.f32 %v1109_v24, %v360_v58  ;;  %v364_v2 = vmul.f32 0.6931472, %v902_v59 }
  0x5f   : > { %v906_v4 = vpop.eup %905  ;;  %634 = vst [vmem:[%s1124_s23 + $0xd0] sm:$0xff] %v904_v63  ;;  %917 = vpow2.f32 %v546_v60  ;;  %v550_v5 = vmul.f32 1.442695, %v451_v61  ;;  %v453_v6 = vmul.f32 %v1109_v24, %v362_v62  ;;  %v265_v25 = vmax.f32 %v201_v15, 1e-20 }
  0x60   : > { %v908_v8 = vpop.eup %907  ;;  %635 = vst [vmem:[%s1124_s23 + $0xd8] sm:$0xff] %v906_v4  ;;  %919 = vpow2.f32 %v548_v0  ;;  %v552_v9 = vmul.f32 1.442695, %v452_v1  ;;  %v454_v10 = vmul.f32 %v1109_v24, %v364_v2  ;;  %v266_v28 = vmax.f32 %v202_v19, 1e-20 }
  0x61   : > { %v910_v12 = vpop.eup %909  ;;  %636 = vst [vmem:[%s1124_s23 + $0xe0] sm:$0xff] %v908_v8  ;;  %921 = vpow2.f32 %v550_v5  ;;  %v554_v13 = vmul.f32 1.442695, %v453_v6  ;;  %v267_v31 = vmax.f32 %v203_v22, 1e-20 }
  0x62   : > { %v912_v16 = vpop.eup %911  ;;  %637 = vst [vmem:[%s1124_s23 + $0xe8] sm:$0xff] %v910_v12  ;;  %923 = vpow2.f32 %v552_v9  ;;  %v556_v17 = vmul.f32 1.442695, %v454_v10  ;;  %v268_v34 = vmax.f32 %v204_v26, 1e-20 }
  0x63   : > { %v914_v20 = vpop.eup %913  ;;  %638 = vst [vmem:[%s1124_s23 + $0xf0] sm:$0xff] %v912_v16  ;;  %925 = vpow2.f32 %v554_v13  ;;  %v269_v37 = vmax.f32 %v205_v29, 1e-20  ;;  %v270_v40 = vmax.f32 %v206_v32, 1e-20  ;;  %v211_v32 = vld [vmem:[%s1091_s19 + $0x1a0] sm:$0xff] }
  0x64   : > { %v916_v23 = vpop.eup %915  ;;  %639 = vst [vmem:[%s1124_s23 + $0xf8] sm:$0xff] %v914_v20  ;;  %927 = vpow2.f32 %v556_v17  ;;  %v271_v43 = vmax.f32 %v207_v35, 1e-20  ;;  %v272_v46 = vmax.f32 %v208_v38, 1e-20 }
  0x65   : > { %v918_v27 = vpop.eup %917  ;;  %640 = vst [vmem:[%s1124_s23 + $0x100] sm:$0xff] %v916_v23  ;;  %929 = vlog2.f32 %v262_v14  ;;  %v273_v49 = vmax.f32 %v209_v41, 1e-20  ;;  %v274_v52 = vmax.f32 %v210_v44, 1e-20  ;;  %v214_v44 = vld [vmem:[%s1091_s19 + $0x1b8] sm:$0xff] }
  0x66   : > { %v920_v30 = vpop.eup %919  ;;  %641 = vst [vmem:[%s1124_s23 + $0x108] sm:$0xff] %v918_v27  ;;  %931 = vlog2.f32 %v263_v18 }
  0x67   : > { %v922_v33 = vpop.eup %921  ;;  %642 = vst [vmem:[%s1124_s23 + $0x110] sm:$0xff] %v920_v30  ;;  %933 = vlog2.f32 %v264_v21 }
  0x68   : > { %v924_v36 = vpop.eup %923  ;;  %643 = vst [vmem:[%s1124_s23 + $0x118] sm:$0xff] %v922_v33  ;;  %935 = vlog2.f32 %v265_v25 }
  0x69   : > { %v926_v39 = vpop.eup %925  ;;  %644 = vst [vmem:[%s1124_s23 + $0x120] sm:$0xff] %v924_v36  ;;  %937 = vlog2.f32 %v266_v28  ;;  %v212_v36 = vld [vmem:[%s1091_s19 + $0x1a8] sm:$0xff] }
  0x6a   : > { %v928_v42 = vpop.eup %927  ;;  %645 = vst [vmem:[%s1124_s23 + $0x128] sm:$0xff] %v926_v39  ;;  %939 = vlog2.f32 %v267_v31 }
  0x6b   : > { %v930_v45 = vpop.eup %929  ;;  %646 = vst [vmem:[%s1124_s23 + $0x130] sm:$0xff] %v928_v42  ;;  %941 = vlog2.f32 %v268_v34 }
  0x6c   : > { %v932_v47 = vpop.eup %931  ;;  %v366_v48 = vmul.f32 0.6931472, %v930_v45  ;;  %943 = vlog2.f32 %v269_v37 }
  0x6d   : > { %v934_v50 = vpop.eup %933  ;;  %v368_v51 = vmul.f32 0.6931472, %v932_v47  ;;  %945 = vlog2.f32 %v270_v40  ;;  %v213_v40 = vld [vmem:[%s1091_s19 + $0x1b0] sm:$0xff]  ;;  %v276_v47 = vmax.f32 %v212_v36, 1e-20 }
  0x6e   : > { %v936_v53 = vpop.eup %935  ;;  %v455_v54 = vmul.f32 %v1109_v24, %v366_v48  ;;  %v370_v55 = vmul.f32 0.6931472, %v934_v50  ;;  %947 = vlog2.f32 %v271_v43  ;;  %v275_v43 = vmax.f32 %v211_v32, 1e-20  ;;  %v215_v48 = vld [vmem:[%s1091_s19 + $0x1c0] sm:$0xff] }
  0x6f   : > { %v938_v56 = vpop.eup %937  ;;  %v456_v57 = vmul.f32 %v1109_v24, %v368_v51  ;;  %v372_v58 = vmul.f32 0.6931472, %v936_v53  ;;  %949 = vlog2.f32 %v272_v46  ;;  %v277_v50 = vmax.f32 %v213_v40, 1e-20  ;;  %v216_v51 = vld [vmem:[%s1091_s19 + $0x1c8] sm:$0xff] }
  0x70   : > { %v940_v59 = vpop.eup %939  ;;  %v558_v60 = vmul.f32 1.442695, %v455_v54  ;;  %v457_v61 = vmul.f32 %v1109_v24, %v370_v55  ;;  %v374_v62 = vmul.f32 0.6931472, %v938_v56  ;;  %951 = vlog2.f32 %v273_v49  ;;  %v217_v54 = vld [vmem:[%s1091_s19 + $0x1d0] sm:$0xff] }
  0x71   : > { %v942_v63 = vpop.eup %941  ;;  %v560_v0 = vmul.f32 1.442695, %v456_v57  ;;  %v458_v1 = vmul.f32 %v1109_v24, %v372_v58  ;;  %v376_v2 = vmul.f32 0.6931472, %v940_v59  ;;  %953 = vlog2.f32 %v274_v52  ;;  %v218_v57 = vld [vmem:[%s1091_s19 + $0x1d8] sm:$0xff] }
  0x72   : > { %v944_v3 = vpop.eup %943  ;;  %955 = vpow2.f32 %v558_v60  ;;  %v562_v4 = vmul.f32 1.442695, %v457_v61  ;;  %v459_v5 = vmul.f32 %v1109_v24, %v374_v62  ;;  %v378_v6 = vmul.f32 0.6931472, %v942_v63  ;;  %v219_v60 = vld [vmem:[%s1091_s19 + $0x1e0] sm:$0xff]  ;;  %v220_v63 = vld [vmem:[%s1091_s19 + $0x1e8] sm:$0xff] }
  0x73   : > { %v946_v7 = vpop.eup %945  ;;  %957 = vpow2.f32 %v560_v0  ;;  %v564_v8 = vmul.f32 1.442695, %v458_v1  ;;  %v460_v9 = vmul.f32 %v1109_v24, %v376_v2  ;;  %v380_v10 = vmul.f32 0.6931472, %v944_v3  ;;  %v221_v2 = vld [vmem:[%s1091_s19 + $0x1f0] sm:$0xff] }
  0x74   : > { %v948_v11 = vpop.eup %947  ;;  %959 = vpow2.f32 %v562_v4  ;;  %v566_v12 = vmul.f32 1.442695, %v459_v5  ;;  %v461_v13 = vmul.f32 %v1109_v24, %v378_v6  ;;  %v382_v14 = vmul.f32 0.6931472, %v946_v7  ;;  %v222_v5 = vld [vmem:[%s1091_s19 + $0x1f8] sm:$0xff] }
  0x75   : > { %v950_v15 = vpop.eup %949  ;;  %961 = vpow2.f32 %v564_v8  ;;  %v568_v16 = vmul.f32 1.442695, %v460_v9  ;;  %v462_v17 = vmul.f32 %v1109_v24, %v380_v10  ;;  %v384_v18 = vmul.f32 0.6931472, %v948_v11 }
  0x76   : > { %v952_v19 = vpop.eup %951  ;;  %963 = vpow2.f32 %v566_v12  ;;  %v570_v20 = vmul.f32 1.442695, %v461_v13  ;;  %v463_v21 = vmul.f32 %v1109_v24, %v382_v14  ;;  %v386_v22 = vmul.f32 0.6931472, %v950_v15 }
  0x77   : > { %v954_v23 = vpop.eup %953  ;;  %965 = vpow2.f32 %v568_v16  ;;  %v572_v25 = vmul.f32 1.442695, %v462_v17  ;;  %v464_v26 = vmul.f32 %v1109_v24, %v384_v18  ;;  %v388_v27 = vmul.f32 0.6931472, %v952_v19 }
  0x78   : > { %v956_v28 = vpop.eup %955  ;;  %967 = vpow2.f32 %v570_v20  ;;  %v574_v29 = vmul.f32 1.442695, %v463_v21  ;;  %v465_v30 = vmul.f32 %v1109_v24, %v386_v22  ;;  %v390_v31 = vmul.f32 0.6931472, %v954_v23 }
  0x79   : > { %v958_v33 = vpop.eup %957  ;;  %647 = vst [vmem:[%s1124_s23 + $0x138] sm:$0xff] %v956_v28  ;;  %969 = vpow2.f32 %v572_v25  ;;  %v576_v34 = vmul.f32 1.442695, %v464_v26  ;;  %v466_v35 = vmul.f32 %v1109_v24, %v388_v27  ;;  %v278_v53 = vmax.f32 %v214_v44, 1e-20 }
  0x7a   : > { %v960_v37 = vpop.eup %959  ;;  %648 = vst [vmem:[%s1124_s23 + $0x140] sm:$0xff] %v958_v33  ;;  %971 = vpow2.f32 %v574_v29  ;;  %v578_v38 = vmul.f32 1.442695, %v465_v30  ;;  %v467_v39 = vmul.f32 %v1109_v24, %v390_v31  ;;  %v279_v56 = vmax.f32 %v215_v48, 1e-20 }
  0x7b   : > { %v962_v41 = vpop.eup %961  ;;  %649 = vst [vmem:[%s1124_s23 + $0x148] sm:$0xff] %v960_v37  ;;  %973 = vpow2.f32 %v576_v34  ;;  %v580_v42 = vmul.f32 1.442695, %v466_v35  ;;  %v280_v59 = vmax.f32 %v216_v51, 1e-20 }
  0x7c   : > { %v964_v45 = vpop.eup %963  ;;  %650 = vst [vmem:[%s1124_s23 + $0x150] sm:$0xff] %v962_v41  ;;  %975 = vpow2.f32 %v578_v38  ;;  %v582_v46 = vmul.f32 1.442695, %v467_v39  ;;  %v281_v62 = vmax.f32 %v217_v54, 1e-20 }
  0x7d   : > { %v966_v49 = vpop.eup %965  ;;  %651 = vst [vmem:[%s1124_s23 + $0x158] sm:$0xff] %v964_v45  ;;  %977 = vpow2.f32 %v580_v42  ;;  %v282_v1 = vmax.f32 %v218_v57, 1e-20  ;;  %v283_v4 = vmax.f32 %v219_v60, 1e-20 }
  0x7e   : > { %v968_v52 = vpop.eup %967  ;;  %652 = vst [vmem:[%s1124_s23 + $0x160] sm:$0xff] %v966_v49  ;;  %979 = vpow2.f32 %v582_v46  ;;  %v284_v7 = vmax.f32 %v220_v63, 1e-20  ;;  %v285_v9 = vmax.f32 %v221_v2, 1e-20 }
  0x7f   : > { %v970_v55 = vpop.eup %969  ;;  %653 = vst [vmem:[%s1124_s23 + $0x168] sm:$0xff] %v968_v52  ;;  %981 = vlog2.f32 %v275_v43  ;;  %v286_v12 = vmax.f32 %v222_v5, 1e-20 }
  0x80   : > { %v972_v58 = vpop.eup %971  ;;  %654 = vst [vmem:[%s1124_s23 + $0x170] sm:$0xff] %v970_v55  ;;  %983 = vlog2.f32 %v276_v47 }
  0x81   : > { %v974_v61 = vpop.eup %973  ;;  %655 = vst [vmem:[%s1124_s23 + $0x178] sm:$0xff] %v972_v58  ;;  %985 = vlog2.f32 %v277_v50 }
  0x82   : > { %v976_v0 = vpop.eup %975  ;;  %656 = vst [vmem:[%s1124_s23 + $0x180] sm:$0xff] %v974_v61  ;;  %987 = vlog2.f32 %v278_v53 }
  0x83   : > { %v978_v3 = vpop.eup %977  ;;  %657 = vst [vmem:[%s1124_s23 + $0x188] sm:$0xff] %v976_v0  ;;  %989 = vlog2.f32 %v279_v56 }
  0x84   : > { %v980_v6 = vpop.eup %979  ;;  %658 = vst [vmem:[%s1124_s23 + $0x190] sm:$0xff] %v978_v3  ;;  %991 = vlog2.f32 %v280_v59 }
  0x85   : > { %v982_v8 = vpop.eup %981  ;;  %659 = vst [vmem:[%s1124_s23 + $0x198] sm:$0xff] %v980_v6  ;;  %993 = vlog2.f32 %v281_v62 }
  0x86   : > { %v984_v10 = vpop.eup %983  ;;  %v392_v11 = vmul.f32 0.6931472, %v982_v8  ;;  %995 = vlog2.f32 %v282_v1 }
  0x87   : > { %v986_v13 = vpop.eup %985  ;;  %v394_v14 = vmul.f32 0.6931472, %v984_v10  ;;  %997 = vlog2.f32 %v283_v4 }
  0x88   : > { %v988_v15 = vpop.eup %987  ;;  %v468_v16 = vmul.f32 %v1109_v24, %v392_v11  ;;  %v396_v17 = vmul.f32 0.6931472, %v986_v13  ;;  %999 = vlog2.f32 %v284_v7 }
  0x89   : > { %v990_v18 = vpop.eup %989  ;;  %v469_v19 = vmul.f32 %v1109_v24, %v394_v14  ;;  %v398_v20 = vmul.f32 0.6931472, %v988_v15  ;;  %1001 = vlog2.f32 %v285_v9 }
  0x8a   : > { %v992_v21 = vpop.eup %991  ;;  %v584_v22 = vmul.f32 1.442695, %v468_v16  ;;  %v470_v23 = vmul.f32 %v1109_v24, %v396_v17  ;;  %v400_v25 = vmul.f32 0.6931472, %v990_v18  ;;  %1003 = vlog2.f32 %v286_v12 }
  0x8b   : > { %v994_v26 = vpop.eup %993  ;;  %v586_v27 = vmul.f32 1.442695, %v469_v19  ;;  %v471_v28 = vmul.f32 %v1109_v24, %v398_v20  ;;  %v402_v29 = vmul.f32 0.6931472, %v992_v21 }
  0x8c   : > { %v996_v30 = vpop.eup %995  ;;  %1005 = vpow2.f32 %v584_v22  ;;  %v588_v31 = vmul.f32 1.442695, %v470_v23  ;;  %v472_v32 = vmul.f32 %v1109_v24, %v400_v25  ;;  %v404_v33 = vmul.f32 0.6931472, %v994_v26 }
  0x8d   : > { %v998_v34 = vpop.eup %997  ;;  %1007 = vpow2.f32 %v586_v27  ;;  %v590_v35 = vmul.f32 1.442695, %v471_v28  ;;  %v473_v36 = vmul.f32 %v1109_v24, %v402_v29  ;;  %v406_v37 = vmul.f32 0.6931472, %v996_v30 }
  0x8e   : > { %v1000_v38 = vpop.eup %999  ;;  %1009 = vpow2.f32 %v588_v31  ;;  %v592_v39 = vmul.f32 1.442695, %v472_v32  ;;  %v474_v40 = vmul.f32 %v1109_v24, %v404_v33  ;;  %v408_v41 = vmul.f32 0.6931472, %v998_v34 }
  0x8f   : > { %v1002_v42 = vpop.eup %1001  ;;  %1011 = vpow2.f32 %v590_v35  ;;  %v594_v43 = vmul.f32 1.442695, %v473_v36  ;;  %v475_v44 = vmul.f32 %v1109_v24, %v406_v37  ;;  %v410_v45 = vmul.f32 0.6931472, %v1000_v38 }
  0x90   : > { %v1004_v46 = vpop.eup %1003  ;;  %1013 = vpow2.f32 %v592_v39  ;;  %v596_v47 = vmul.f32 1.442695, %v474_v40  ;;  %v476_v48 = vmul.f32 %v1109_v24, %v408_v41  ;;  %v412_v49 = vmul.f32 0.6931472, %v1002_v42 }
  0x91   : > { %1015 = vpow2.f32 %v594_v43  ;;  %v598_v50 = vmul.f32 1.442695, %v475_v44  ;;  %v477_v51 = vmul.f32 %v1109_v24, %v410_v45  ;;  %v414_v52 = vmul.f32 0.6931472, %v1004_v46 }
  0x92   : > { %v1006_v53 = vpop.eup %1005  ;;  %1017 = vpow2.f32 %v596_v47  ;;  %v600_v54 = vmul.f32 1.442695, %v476_v48  ;;  %v478_v55 = vmul.f32 %v1109_v24, %v412_v49 }
  0x93   : > { %v1008_v56 = vpop.eup %1007  ;;  %660 = vst [vmem:[%s1124_s23 + $0x1a0] sm:$0xff] %v1006_v53  ;;  %1019 = vpow2.f32 %v598_v50  ;;  %v602_v57 = vmul.f32 1.442695, %v477_v51  ;;  %v479_v58 = vmul.f32 %v1109_v24, %v414_v52 }
  0x94   : > { %v1010_v59 = vpop.eup %1009  ;;  %661 = vst [vmem:[%s1124_s23 + $0x1a8] sm:$0xff] %v1008_v56  ;;  %1021 = vpow2.f32 %v600_v54  ;;  %v604_v60 = vmul.f32 1.442695, %v478_v55 }
  0x95   : > { %v1012_v61 = vpop.eup %1011  ;;  %662 = vst [vmem:[%s1124_s23 + $0x1b0] sm:$0xff] %v1010_v59  ;;  %1023 = vpow2.f32 %v602_v57  ;;  %v606_v62 = vmul.f32 1.442695, %v479_v58 }
  0x96   : > { %v1014_v63 = vpop.eup %1013  ;;  %663 = vst [vmem:[%s1124_s23 + $0x1b8] sm:$0xff] %v1012_v61  ;;  %1025 = vpow2.f32 %v604_v60 }
  0x97   : > { %v1016_v0 = vpop.eup %1015  ;;  %664 = vst [vmem:[%s1124_s23 + $0x1c0] sm:$0xff] %v1014_v63  ;;  %1027 = vpow2.f32 %v606_v62 }
  0x98   : > { %v1018_v24 = vpop.eup %1017  ;;  %665 = vst [vmem:[%s1124_s23 + $0x1c8] sm:$0xff] %v1016_v0 }
  0x99   : > { %v1020_v1 = vpop.eup %1019  ;;  %666 = vst [vmem:[%s1124_s23 + $0x1d0] sm:$0xff] %v1018_v24 }
  0x9a   : > { %v1022_v2 = vpop.eup %1021  ;;  %667 = vst [vmem:[%s1124_s23 + $0x1d8] sm:$0xff] %v1020_v1 }
  0x9b   : > { %v1024_v3 = vpop.eup %1023  ;;  %668 = vst [vmem:[%s1124_s23 + $0x1e0] sm:$0xff] %v1022_v2 }
  0x9c   : > { %v1026_v4 = vpop.eup %1025  ;;  %669 = vst [vmem:[%s1124_s23 + $0x1e8] sm:$0xff] %v1024_v3 }
  0x9d   : > { %v1028_v5 = vpop.eup %1027  ;;  %670 = vst [vmem:[%s1124_s23 + $0x1f0] sm:$0xff] %v1026_v4 }
  0x9e   : > { %671 = vst [vmem:[%s1124_s23 + $0x1f8] sm:$0xff] %v1028_v5 }
  0x9f PF: > { %s13_s9 = sadd.s32 1, %s1054_s9  }
  0xa0   : > { %p10_p7 = scmp.ge.s32.totalorder %s13_s9, 4  }
  0xa2   :  { %12 = sbr.rel (!%p10_p7) target bundleno = 1 (0x1), region = 63 }
  0xa7   :  { %693 = vsyncpa [#allocation3], 1 }
  0xa8   :  { %695 = vsyncpa [#allocation3 + $0x1], 1 }

</bundles_post_ra>
